<compile_context>
chip_gen: v7x
topology: tpu7x:2x2x1
jax: 0.10.0
libtpu: 0.0.40
codegen_flags: <defaults>
</compile_context>

<pallas_src>
import jax
import jax.numpy as jnp
from jax.experimental import pallas as pl
from jax.experimental.pallas import tpu as pltpu

OUT_PAD = 128          # lane-dense padded logits width (real width = 10)
MAX_BATCH_TILE = 512   # rows per grid step for large batches


# ---------------------------------------------------------------------------
# Pallas kernel: whole network for one batch tile, all intermediates in VMEM
# ---------------------------------------------------------------------------
def fused_net_kernel(x_ref, w1_ref, b1_ref, w2_ref, b2_ref,
                     wd1_ref, bd1_ref, wd2_ref, bd2_ref, o_ref):
    # conv1 (as dense matmul) + bias + ReLU          (BT,784)->(BT,288)
    h = jnp.dot(x_ref[...], w1_ref[...], preferred_element_type=jnp.float32)
    h = jnp.maximum(h + b1_ref[...], 0.0)
    # conv2 (as dense matmul) + bias + ReLU          (BT,288)->(BT,48)
    h = jnp.dot(h, w2_ref[...], preferred_element_type=jnp.float32)
    h = jnp.maximum(h + b2_ref[...], 0.0)
    # d1 + ReLU                                      (BT,48)->(BT,48)
    h = jnp.dot(h, wd1_ref[...], preferred_element_type=jnp.float32)
    h = jnp.maximum(h + bd1_ref[...], 0.0)
    # d2 (padded to 128 output lanes)                (BT,48)->(BT,128)
    o_ref[...] = jnp.dot(h, wd2_ref[...],
                         preferred_element_type=jnp.float32) + bd2_ref[...]


# ---------------------------------------------------------------------------
# Parameter preparation (one-time, outside the hot path)
# ---------------------------------------------------------------------------
def _conv_as_matrix(w, in_shape, stride):
    """Dense M with flatten_CHW(conv(x)) == flatten_CHW(x) @ M (VALID, no bias).

    w: PyTorch OIHW layout (OC, IC, k, k). Flatten order on both sides is
    PyTorch's (C, H, W), so no extra permutation of the d1 weights is needed.
    """
    ic, h, wd = in_shape
    n_in = ic * h * wd
    basis = jnp.eye(n_in, dtype=jnp.float32).reshape(n_in, ic, h, wd)
    dn = jax.lax.conv_dimension_numbers(basis.shape, w.shape,
                                        ("NCHW", "OIHW", "NCHW"))
    out = jax.lax.conv_general_dilated(basis, w, (stride, stride), "VALID",
                                       dimension_numbers=dn)
    return out.reshape(n_in, -1)   # (n_in, OC*Ho*Wo)


def prepare_params(params):
    w1m = _conv_as_matrix(params["w_conv1"], (1, 28, 28), 2)          # (784, 288)
    b1v = jnp.repeat(params["b_conv1"], 12 * 12).reshape(1, 288)
    w2m = _conv_as_matrix(params["w_conv2"], (2, 12, 12), 2)          # (288, 48)
    b2v = jnp.repeat(params["b_conv2"], 4 * 4).reshape(1, 48)
    wd1 = params["w_d1"].T                                            # (48, 48)
    bd1 = params["b_d1"].reshape(1, 48)
    wd2 = jnp.zeros((48, OUT_PAD), jnp.float32).at[:, :10].set(params["w_d2"].T)
    bd2 = jnp.zeros((1, OUT_PAD), jnp.float32).at[0, :10].set(params["b_d2"])
    return {"w1m": w1m, "b1v": b1v, "w2m": w2m, "b2v": b2v,
            "wd1": wd1, "bd1": bd1, "wd2": wd2, "bd2": bd2}


# ---------------------------------------------------------------------------
# Forward: single fused pallas_call
# ---------------------------------------------------------------------------
def forward(prep, x):
    B = x.shape[0]
    x2d = x.reshape(B, 28 * 28).astype(jnp.float32)          # NCHW, C=1 -> (B,784)

    # Batch tiling: one block if small, 512-row tiles (padded) if large.
    if B <= MAX_BATCH_TILE:
        bt, b_pad = B, B
    else:
        bt = MAX_BATCH_TILE
        b_pad = ((B + bt - 1) // bt) * bt
        x2d = jnp.pad(x2d, ((0, b_pad - B), (0, 0)))
    n_tiles = b_pad // bt

    const = lambda i: (0, 0)   # weights/biases: same block every step -> VMEM-resident
    out = pl.pallas_call(
        fused_net_kernel,
        out_shape=jax.ShapeDtypeStruct((b_pad, OUT_PAD), jnp.float32),
        grid_spec=pltpu.PrefetchScalarGridSpec(
            num_scalar_prefetch=0,
            grid=(n_tiles,),
            in_specs=[
                pl.BlockSpec((bt, 784), lambda i: (i, 0)),    # input batch tile
                pl.BlockSpec((784, 288), const),              # conv1 as matrix
                pl.BlockSpec((1, 288), const),
                pl.BlockSpec((288, 48), const),               # conv2 as matrix
                pl.BlockSpec((1, 48), const),
                pl.BlockSpec((48, 48), const),                # d1
                pl.BlockSpec((1, 48), const),
                pl.BlockSpec((48, OUT_PAD), const),           # d2 (lane-padded)
                pl.BlockSpec((1, OUT_PAD), const),
            ],
            out_specs=pl.BlockSpec((bt, OUT_PAD), lambda i: (i, 0)),
        ),
        compiler_params=pltpu.CompilerParams(
            dimension_semantics=("parallel",),       # shards across v7x's 2 TCs
            vmem_limit_bytes=32 * 1024 * 1024,
        ),
    )(x2d, prep["w1m"], prep["b1v"], prep["w2m"], prep["b2v"],
      prep["wd1"], prep["bd1"], prep["wd2"], prep["bd2"])

    return out[:B, :10]


# ---------------------------------------------------------------------------
# Parameters & pure-JAX reference (sanity check only)
# ---------------------------------------------------------------------------
def init_params(key):
    ks = jax.random.split(key, 8)
    return {
        "w_conv1": jax.random.normal(ks[0], (2, 1, 5, 5), jnp.float32) * 0.1,
        "b_conv1": jax.random.normal(ks[1], (2,), jnp.float32) * 0.1,
        "w_conv2": jax.random.normal(ks[2], (3, 2, 5, 5), jnp.float32) * 0.1,
        "b_conv2": jax.random.normal(ks[3], (3,), jnp.float32) * 0.1,
        "w_d1": jax.random.normal(ks[4], (48, 48), jnp.float32) * 0.1,
        "b_d1": jax.random.normal(ks[5], (48,), jnp.float32) * 0.1,
        "w_d2": jax.random.normal(ks[6], (10, 48), jnp.float32) * 0.1,
        "b_d2": jax.random.normal(ks[7], (10,), jnp.float32) * 0.1,
    }


def forward_ref(params, x):
    dn = jax.lax.conv_dimension_numbers(x.shape, params["w_conv1"].shape,
                                        ("NCHW", "OIHW", "NCHW"))
    y = jax.lax.conv_general_dilated(x, params["w_conv1"], (2, 2), "VALID",
                                     dimension_numbers=dn)
    y = jax.nn.relu(y + params["b_conv1"][None, :, None, None])
    dn2 = jax.lax.conv_dimension_numbers(y.shape, params["w_conv2"].shape,
                                         ("NCHW", "OIHW", "NCHW"))
    y = jax.lax.conv_general_dilated(y, params["w_conv2"], (2, 2), "VALID",
                                     dimension_numbers=dn2)
    y = jax.nn.relu(y + params["b_conv2"][None, :, None, None])
    y = y.reshape(y.shape[0], -1)
    y = jax.nn.relu(y @ params["w_d1"].T + params["b_d1"])
    return y @ params["w_d2"].T + params["b_d2"]


if __name__ == "__main__":
    key = jax.random.PRNGKey(0)
    kp, kx = jax.random.split(key)
    params = init_params(kp)
    # Input implied by the module: 28x28x1 (two k=5/s=2 convs -> 3*4*4 = 48)
    x = jax.random.normal(kx, (2, 1, 28, 28), jnp.float32)

    prep = prepare_params(params)                       # one-time weight prep
    fwd = jax.jit(forward)
    logits = jax.block_until_ready(fwd(prep, x))
    ref = jax.block_until_ready(forward_ref(params, x))

    assert logits.shape == (2, 10)
    assert jnp.allclose(logits, ref, atol=1e-3, rtol=1e-3), \
        float(jnp.max(jnp.abs(logits - ref)))
    print("KERNEL_OK")
</pallas_src>

<mosaic_0001>
module attributes {stable_mosaic.version = 11 : i64} {
  func.func @fused_net_kernel(%arg0: i32, %arg1: memref<2x784xf32, #tpu.memory_space<vmem>>, %arg2: memref<784x288xf32, #tpu.memory_space<vmem>>, %arg3: memref<1x288xf32, #tpu.memory_space<vmem>>, %arg4: memref<288x48xf32, #tpu.memory_space<vmem>>, %arg5: memref<1x48xf32, #tpu.memory_space<vmem>>, %arg6: memref<48x48xf32, #tpu.memory_space<vmem>>, %arg7: memref<1x48xf32, #tpu.memory_space<vmem>>, %arg8: memref<48x128xf32, #tpu.memory_space<vmem>>, %arg9: memref<1x128xf32, #tpu.memory_space<vmem>>, %arg10: memref<2x128xf32, #tpu.memory_space<vmem>>) attributes {dimension_semantics = [#tpu.dimension_semantics<parallel>], iteration_bounds = array<i64: 1>, scalar_prefetch = 0 : i64, scratch_operands = 0 : i64, tpu.core_type = #tpu.core_type<tc>, window_params = [{transform_indices = @transform_0, window_bounds = array<i64: 2, 784>}, {pipeline_mode = #tpu.pipeline_mode<synchronous>, transform_indices = @transform_1, window_bounds = array<i64: 784, 288>}, {pipeline_mode = #tpu.pipeline_mode<synchronous>, transform_indices = @transform_2, window_bounds = array<i64: 1, 288>}, {pipeline_mode = #tpu.pipeline_mode<synchronous>, transform_indices = @transform_3, window_bounds = array<i64: 288, 48>}, {pipeline_mode = #tpu.pipeline_mode<synchronous>, transform_indices = @transform_4, window_bounds = array<i64: 1, 48>}, {pipeline_mode = #tpu.pipeline_mode<synchronous>, transform_indices = @transform_5, window_bounds = array<i64: 48, 48>}, {pipeline_mode = #tpu.pipeline_mode<synchronous>, transform_indices = @transform_6, window_bounds = array<i64: 1, 48>}, {pipeline_mode = #tpu.pipeline_mode<synchronous>, transform_indices = @transform_7, window_bounds = array<i64: 48, 128>}, {pipeline_mode = #tpu.pipeline_mode<synchronous>, transform_indices = @transform_8, window_bounds = array<i64: 1, 128>}, {transform_indices = @transform_9, window_bounds = array<i64: 2, 128>}]} {
    %c0 = arith.constant 0 : index
    %c0_0 = arith.constant 0 : index
    %0 = vector.load %arg1[%c0, %c0_0] : memref<2x784xf32, #tpu.memory_space<vmem>>, vector<2x784xf32>
    %c0_1 = arith.constant 0 : index
    %c0_2 = arith.constant 0 : index
    %1 = vector.load %arg2[%c0_1, %c0_2] : memref<784x288xf32, #tpu.memory_space<vmem>>, vector<784x288xf32>
    %cst = arith.constant dense<0.000000e+00> : vector<2x288xf32>
    %2 = tpu.matmul %0, %1, %cst {dimension_numbers = #tpu.dot_dimension_numbers<[1], [0], [0], [1], [0, 0, 1, 1], [], []>} : vector<2x784xf32>, vector<784x288xf32>, vector<2x288xf32> -> vector<2x288xf32>
    %c0_3 = arith.constant 0 : index
    %c0_4 = arith.constant 0 : index
    %3 = vector.load %arg3[%c0_3, %c0_4] : memref<1x288xf32, #tpu.memory_space<vmem>>, vector<1x288xf32>
    %4 = vector.broadcast %3 : vector<1x288xf32> to vector<2x288xf32>
    %5 = arith.addf %2, %4 : vector<2x288xf32>
    %cst_5 = arith.constant 0.000000e+00 : f32
    %6 = vector.broadcast %cst_5 : f32 to vector<2x288xf32>
    %7 = arith.maximumf %5, %6 : vector<2x288xf32>
    %c0_6 = arith.constant 0 : index
    %c0_7 = arith.constant 0 : index
    %8 = vector.load %arg4[%c0_6, %c0_7] : memref<288x48xf32, #tpu.memory_space<vmem>>, vector<288x48xf32>
    %cst_8 = arith.constant dense<0.000000e+00> : vector<2x48xf32>
    %9 = tpu.matmul %7, %8, %cst_8 {dimension_numbers = #tpu.dot_dimension_numbers<[1], [0], [0], [1], [0, 0, 1, 1], [], []>} : vector<2x288xf32>, vector<288x48xf32>, vector<2x48xf32> -> vector<2x48xf32>
    %c0_9 = arith.constant 0 : index
    %c0_10 = arith.constant 0 : index
    %10 = vector.load %arg5[%c0_9, %c0_10] : memref<1x48xf32, #tpu.memory_space<vmem>>, vector<1x48xf32>
    %11 = vector.broadcast %10 : vector<1x48xf32> to vector<2x48xf32>
    %12 = arith.addf %9, %11 : vector<2x48xf32>
    %cst_11 = arith.constant 0.000000e+00 : f32
    %13 = vector.broadcast %cst_11 : f32 to vector<2x48xf32>
    %14 = arith.maximumf %12, %13 : vector<2x48xf32>
    %c0_12 = arith.constant 0 : index
    %c0_13 = arith.constant 0 : index
    %15 = vector.load %arg6[%c0_12, %c0_13] : memref<48x48xf32, #tpu.memory_space<vmem>>, vector<48x48xf32>
    %cst_14 = arith.constant dense<0.000000e+00> : vector<2x48xf32>
    %16 = tpu.matmul %14, %15, %cst_14 {dimension_numbers = #tpu.dot_dimension_numbers<[1], [0], [0], [1], [0, 0, 1, 1], [], []>} : vector<2x48xf32>, vector<48x48xf32>, vector<2x48xf32> -> vector<2x48xf32>
    %c0_15 = arith.constant 0 : index
    %c0_16 = arith.constant 0 : index
    %17 = vector.load %arg7[%c0_15, %c0_16] : memref<1x48xf32, #tpu.memory_space<vmem>>, vector<1x48xf32>
    %18 = vector.broadcast %17 : vector<1x48xf32> to vector<2x48xf32>
    %19 = arith.addf %16, %18 : vector<2x48xf32>
    %cst_17 = arith.constant 0.000000e+00 : f32
    %20 = vector.broadcast %cst_17 : f32 to vector<2x48xf32>
    %21 = arith.maximumf %19, %20 : vector<2x48xf32>
    %c0_18 = arith.constant 0 : index
    %c0_19 = arith.constant 0 : index
    %22 = vector.load %arg8[%c0_18, %c0_19] : memref<48x128xf32, #tpu.memory_space<vmem>>, vector<48x128xf32>
    %cst_20 = arith.constant dense<0.000000e+00> : vector<2x128xf32>
    %23 = tpu.matmul %21, %22, %cst_20 {dimension_numbers = #tpu.dot_dimension_numbers<[1], [0], [0], [1], [0, 0, 1, 1], [], []>} : vector<2x48xf32>, vector<48x128xf32>, vector<2x128xf32> -> vector<2x128xf32>
    %c0_21 = arith.constant 0 : index
    %c0_22 = arith.constant 0 : index
    %24 = vector.load %arg9[%c0_21, %c0_22] : memref<1x128xf32, #tpu.memory_space<vmem>>, vector<1x128xf32>
    %25 = vector.broadcast %24 : vector<1x128xf32> to vector<2x128xf32>
    %26 = arith.addf %23, %25 : vector<2x128xf32>
    %c0_23 = arith.constant 0 : index
    %c0_24 = arith.constant 0 : index
    %27 = vector.load %arg10[%c0_23, %c0_24] : memref<2x128xf32, #tpu.memory_space<vmem>>, vector<2x128xf32>
    tpu.vector_store %arg10[%c0_23, %c0_24], %26 {strides = array<i32>} : memref<2x128xf32, #tpu.memory_space<vmem>>, vector<2x128xf32>,
    return
  }
  func.func @transform_0(%arg0: i32) -> (i32, i32) {
    %c0_i32 = arith.constant 0 : i32
    %c0_i32_0 = arith.constant 0 : i32
    return %arg0, %c0_i32 : i32, i32
  }
  func.func @transform_1(%arg0: i32) -> (i32, i32) {
    %c0_i32 = arith.constant 0 : i32
    %c0_i32_0 = arith.constant 0 : i32
    %c0_i32_1 = arith.constant 0 : i32
    return %c0_i32, %c0_i32_0 : i32, i32
  }
  func.func @transform_2(%arg0: i32) -> (i32, i32) {
    %c0_i32 = arith.constant 0 : i32
    %c0_i32_0 = arith.constant 0 : i32
    %c0_i32_1 = arith.constant 0 : i32
    return %c0_i32, %c0_i32_0 : i32, i32
  }
  func.func @transform_3(%arg0: i32) -> (i32, i32) {
    %c0_i32 = arith.constant 0 : i32
    %c0_i32_0 = arith.constant 0 : i32
    %c0_i32_1 = arith.constant 0 : i32
    return %c0_i32, %c0_i32_0 : i32, i32
  }
  func.func @transform_4(%arg0: i32) -> (i32, i32) {
    %c0_i32 = arith.constant 0 : i32
    %c0_i32_0 = arith.constant 0 : i32
    %c0_i32_1 = arith.constant 0 : i32
    return %c0_i32, %c0_i32_0 : i32, i32
  }
  func.func @transform_5(%arg0: i32) -> (i32, i32) {
    %c0_i32 = arith.constant 0 : i32
    %c0_i32_0 = arith.constant 0 : i32
    %c0_i32_1 = arith.constant 0 : i32
    return %c0_i32, %c0_i32_0 : i32, i32
  }
  func.func @transform_6(%arg0: i32) -> (i32, i32) {
    %c0_i32 = arith.constant 0 : i32
    %c0_i32_0 = arith.constant 0 : i32
    %c0_i32_1 = arith.constant 0 : i32
    return %c0_i32, %c0_i32_0 : i32, i32
  }
  func.func @transform_7(%arg0: i32) -> (i32, i32) {
    %c0_i32 = arith.constant 0 : i32
    %c0_i32_0 = arith.constant 0 : i32
    %c0_i32_1 = arith.constant 0 : i32
    return %c0_i32, %c0_i32_0 : i32, i32
  }
  func.func @transform_8(%arg0: i32) -> (i32, i32) {
    %c0_i32 = arith.constant 0 : i32
    %c0_i32_0 = arith.constant 0 : i32
    %c0_i32_1 = arith.constant 0 : i32
    return %c0_i32, %c0_i32_0 : i32, i32
  }
  func.func @transform_9(%arg0: i32) -> (i32, i32) {
    %c0_i32 = arith.constant 0 : i32
    %c0_i32_0 = arith.constant 0 : i32
    return %arg0, %c0_i32 : i32, i32
  }
}

</mosaic_0001>

<bundles_post_ra>
// kernel: forward.1
= control target key start
LH: loop header
LB: loop body
LE: loop exit
PB: predicated region body
PF: predicated region fallthrough
CT: control target
= control target key end

     0   :  { %v1942_v7 = vmov 0.0   ;;  %v331_v20 = vlaneseq  ;;  %v1943_v21 = vmov 1983009808   ;;  %vm387_vm0 = vcmask 130048   ;;  %s3122_s0 = inlined_call_operand.vmem [shape: f32[2,784], index: 0, kind: input, shape index: {}]   ;;  %s3123_s1 = inlined_call_operand.vmem [shape: f32[784,288], index: 1, kind: input, shape index: {}]   ;;  %s3124_s2 = inlined_call_operand.vmem [shape: f32[1,288], index: 2, kind: input, shape index: {}]   ;;  %s3125_s3 = inlined_call_operand.vmem [shape: f32[288,48], index: 3, kind: input, shape index: {}]   ;;  %s3126_s4 = inlined_call_operand.vmem [shape: f32[1,48], index: 4, kind: input, shape index: {}]   ;;  %s3127_s5 = inlined_call_operand.vmem [shape: f32[48,48], index: 5, kind: input, shape index: {}]   ;;  %s3128_s6 = inlined_call_operand.vmem [shape: f32[1,48], index: 6, kind: input, shape index: {}]   ;;  %s3129_s7 = inlined_call_operand.vmem [shape: f32[48,128], index: 7, kind: input, shape index: {}]   ;;  %s3130_s8 = inlined_call_operand.vmem [shape: f32[1,128], index: 8, kind: input, shape index: {}]   ;;  %s3131_s9 = inlined_call_operand.hbm [shape: f32[2,128], index: 9, kind: output, shape index: {}]  }
   0x1   :  { %v36_v0 = vld [vmem:[%s3123_s1 + $0x8] sm:$0xff]  ;;  %v39_v1 = vld [vmem:[%s3123_s1 + $0x20] sm:$0xff]  ;;  %v38_v4 = vld [vmem:[%s3123_s1 + $0x18] sm:$0xff]  ;;  %667 = vmatprep.mubr.f32.mxu1 %v1942_v7  ;;  %v350_v22 = vunpack.c.l.s4 %v1943_v21 }
   0x2   :  { %v35_v2 = vld [vmem:[%s3123_s1] sm:$0xff]  ;;  %v1552_v3 = vpack.c.bf16 %v39_v1, %v36_v0  ;;  %v42_v5 = vld [vmem:[%s3123_s1 + $0x38] sm:$0xff]  ;;  %v45_v6 = vld [vmem:[%s3123_s1 + $0x50] sm:$0xff]  ;;  %v2052_v29 = vshrl.u32 %v331_v20, 7 }
   0x3   :  { %v1554_v8 = vpack.c.bf16 %v38_v4, %v35_v2  ;;  %v1556_v9 = vpack.c.bf16 %v45_v6, %v42_v5  ;;  %v41_v10 = vld [vmem:[%s3123_s1 + $0x30] sm:$0xff]  ;;  %v44_v11 = vld [vmem:[%s3123_s1 + $0x48] sm:$0xff]  ;;  %v51_v13 = vld [vmem:[%s3123_s1 + $0x80] sm:$0xff]  ;;  %v351_v30 = vunpack.c.0.s8 %v350_v22 }
   0x4   :  { %v48_v12 = vld [vmem:[%s3123_s1 + $0x68] sm:$0xff]  ;;  %1553 = vmatprep.subr.bf16.mxu0 %v1552_v3  ;;  %v1558_v14 = vpack.c.bf16 %v44_v11, %v41_v10  ;;  %v47_v16 = vld [vmem:[%s3123_s1 + $0x60] sm:$0xff]  ;;  %v50_v17 = vld [vmem:[%s3123_s1 + $0x78] sm:$0xff] }
   0x5   :  { %1555 = vmatpush1.bf16.msra.mxu0 %v1554_v8  ;;  %v1560_v15 = vpack.c.bf16 %v51_v13, %v48_v12  ;;  %v54_v18 = vld [vmem:[%s3123_s1 + $0x98] sm:$0xff]  ;;  %v57_v19 = vld [vmem:[%s3123_s1 + $0xb0] sm:$0xff]  ;;  %v1562_v23 = vpack.c.bf16 %v50_v17, %v47_v16  ;;  %v56_v26 = vld [vmem:[%s3123_s1 + $0xa8] sm:$0xff]  ;;  %v2082_v44 = vsub.s32 %v351_v30, %v2052_v29 }
   0x6   :  { %1557 = vmatprep.subr.bf16.mxu0 %v1556_v9  ;;  %v1564_v24 = vpack.c.bf16 %v57_v19, %v54_v18  ;;  %v53_v25 = vld [vmem:[%s3123_s1 + $0x90] sm:$0xff]  ;;  %v60_v27 = vld [vmem:[%s3123_s1 + $0xc8] sm:$0xff]  ;;  %v63_v28 = vld [vmem:[%s3123_s1 + $0xe0] sm:$0xff] }
   0x7   :  { %v1566_v31 = vpack.c.bf16 %v56_v26, %v53_v25  ;;  %v59_v32 = vld [vmem:[%s3123_s1 + $0xc0] sm:$0xff]  ;;  %v62_v33 = vld [vmem:[%s3123_s1 + $0xd8] sm:$0xff]  ;;  %v1568_v35 = vpack.c.bf16 %v63_v28, %v60_v27  ;;  %v69_v36 = vld [vmem:[%s3123_s1 + $0x110] sm:$0xff] }
   0x8   :  { %v66_v34 = vld [vmem:[%s3123_s1 + $0xf8] sm:$0xff]  ;;  %v324_v37 = vld [vmem:[%s3123_s1 + $0x908] sm:$0xff]  ;;  %v327_v38 = vld [vmem:[%s3123_s1 + $0x920] sm:$0xff]  ;;  %v1570_v45 = vpack.c.bf16 %v62_v33, %v59_v32 }
   0x9   :  { %1559 = vmatpush1.bf16.msra.mxu0 %v1558_v14  ;;  %v1744_v39 = vpack.c.bf16 %v327_v38, %v324_v37  ;;  %v323_v40 = vld [vmem:[%s3123_s1 + $0x900] sm:$0xff]  ;;  %v326_v41 = vld [vmem:[%s3123_s1 + $0x918] sm:$0xff]  ;;  %v65_v42 = vld [vmem:[%s3123_s1 + $0xf0] sm:$0xff]  ;;  %v1572_v46 = vpack.c.bf16 %v69_v36, %v66_v34 }
   0xa   :  { %1561 = vmatprep.subr.bf16.mxu0 %v1560_v15  ;;  %v1746_v43 = vpack.c.bf16 %v326_v41, %v323_v40  ;;  %v85_v47 = vld [vmem:[%s3123_s1 + $0x190] sm:$0xff]  ;;  %v88_v48 = vld [vmem:[%s3123_s1 + $0x1a8] sm:$0xff]  ;;  %v75_v57 = vld [vmem:[%s3123_s1 + $0x140] sm:$0xff] }
   0xb   :  { %1745 = vmatprep.subr.bf16.mxu1 %v1744_v39  ;;  %v34_v49 = vld [vmem:[%s3122_s0 + $0x8] sm:$0x3f]  ;;  %v1748_v51 = vpack.c.bf16 %v88_v48, %v85_v47  ;;  %v37_v53 = vld [vmem:[%s3123_s1 + $0x10] sm:$0xff]  ;;  %v91_v60 = vld [vmem:[%s3123_s1 + $0x1c0] sm:$0xff] }
   0xc   :  { %v68_v50 = vld [vmem:[%s3123_s1 + $0x108] sm:$0xff]  ;;  %1747 = vmatpush1.bf16.msra.mxu1 %v1746_v43  ;;  %v365_v52 = vcombine.high %v34_v49, %v34_v49  ;;  %v2103_v55 = vrot.slane %v34_v49, %v2082_v44  ;;  %v94_v61 = vld [vmem:[%s3123_s1 + $0x1d8] sm:$0xff]  ;;  %v43_v62 = vld [vmem:[%s3123_s1 + $0x40] sm:$0xff] }
   0xd   :  { %1563 = vmatpush1.bf16.msra.mxu0 %v1562_v23  ;;  %v40_v54 = vld [vmem:[%s3123_s1 + $0x28] sm:$0xff]  ;;  %1749 = vmatprep.subr.bf16.mxu1 %v1748_v51  ;;  %v1574_v63 = vpack.c.bf16 %v68_v50, %v65_v42  ;;  %v1752_v0 = vpack.c.bf16 %v94_v61, %v91_v60  ;;  %v46_v1 = vld [vmem:[%s3123_s1 + $0x58] sm:$0xff]  ;;  %v71_v3 = vld [vmem:[%s3123_s1 + $0x120] sm:$0xff] }
   0xe   :  { %1565 = vmatprep.subr.bf16.mxu0 %v1564_v24  ;;  %v72_v56 = vld [vmem:[%s3123_s1 + $0x128] sm:$0xff]  ;;  %v1750_v58 = vpack.c.bf16 %v40_v54, %v37_v53  ;;  %v2112_v59 = vrot.slane %v365_v52, %v2082_v44  ;;  %v74_v4 = vld [vmem:[%s3123_s1 + $0x138] sm:$0xff]  ;;  %v97_v5 = vld [vmem:[%s3123_s1 + $0x1f0] sm:$0xff]  ;;  %v1754_v9 = vpack.c.bf16 %v46_v1, %v43_v62 }
   0xf   :  { %v1576_v2 = vpack.c.bf16 %v75_v57, %v72_v56  ;;  %v78_v6 = vld [vmem:[%s3123_s1 + $0x158] sm:$0xff]  ;;  %v81_v8 = vld [vmem:[%s3123_s1 + $0x170] sm:$0xff]  ;;  %v100_v10 = vld [vmem:[%s3123_s1 + $0x208] sm:$0xff]  ;;  %v1578_v14 = vpack.c.bf16 %v74_v4, %v71_v3 }
  0x10   :  { %1334 = vmatmul.mubr.msk.f32.vlgmr.msra.gmra.mrb[0].mxu1 %vm387_vm0, %v2112_v59  ;;  %v1756_v11 = vpack.c.bf16 %v100_v10, %v97_v5  ;;  %v49_v12 = vld [vmem:[%s3123_s1 + $0x70] sm:$0xff]  ;;  %v52_v13 = vld [vmem:[%s3123_s1 + $0x88] sm:$0xff]  ;;  %v103_v15 = vld [vmem:[%s3123_s1 + $0x220] sm:$0xff]  ;;  %v1580_v17 = vpack.c.bf16 %v81_v8, %v78_v6 }
  0x11   :  { %1567 = vmatpush1.bf16.msra.mxu0 %v1566_v31  ;;  %1751 = vmatpush3.bf16.msra.mxu1 %v1750_v58  ;;  %v106_v16 = vld [vmem:[%s3123_s1 + $0x238] sm:$0xff]  ;;  %v77_v18 = vld [vmem:[%s3123_s1 + $0x150] sm:$0xff]  ;;  %v80_v19 = vld [vmem:[%s3123_s1 + $0x168] sm:$0xff]  ;;  %v1758_v22 = vpack.c.bf16 %v52_v13, %v49_v12 }
  0x12   :  { %1569 = vmatprep.subr.bf16.mxu0 %v1568_v35  ;;  %1753 = vmatprep.subr.bf16.mxu1 %v1752_v0  ;;  %v84_v20 = vld [vmem:[%s3123_s1 + $0x188] sm:$0xff]  ;;  %v87_v21 = vld [vmem:[%s3123_s1 + $0x1a0] sm:$0xff]  ;;  %v1760_v23 = vpack.c.bf16 %v106_v16, %v103_v15  ;;  %v58_v25 = vld [vmem:[%s3123_s1 + $0xb8] sm:$0xff]  ;;  %v1582_v26 = vpack.c.bf16 %v80_v19, %v77_v18 }
  0x13   :  { %v55_v24 = vld [vmem:[%s3123_s1 + $0xa0] sm:$0xff]  ;;  %v109_v27 = vld [vmem:[%s3123_s1 + $0x250] sm:$0xff]  ;;  %v112_v28 = vld [vmem:[%s3123_s1 + $0x268] sm:$0xff]  ;;  %v1584_v30 = vpack.c.bf16 %v87_v21, %v84_v20 }
  0x14   :  { %v83_v31 = vld [vmem:[%s3123_s1 + $0x180] sm:$0xff]  ;;  %v86_v32 = vld [vmem:[%s3123_s1 + $0x198] sm:$0xff]  ;;  %v93_v34 = vld [vmem:[%s3123_s1 + $0x1d0] sm:$0xff]  ;;  %v1762_v35 = vpack.c.bf16 %v58_v25, %v55_v24  ;;  %v1764_v36 = vpack.c.bf16 %v112_v28, %v109_v27 }
  0x15   :  { %1571 = vmatpush1.bf16.msra.mxu0 %v1570_v45  ;;  %1755 = vmatpush3.bf16.msra.mxu1 %v1754_v9  ;;  %v90_v33 = vld [vmem:[%s3123_s1 + $0x1b8] sm:$0xff]  ;;  %v61_v37 = vld [vmem:[%s3123_s1 + $0xd0] sm:$0xff]  ;;  %v64_v38 = vld [vmem:[%s3123_s1 + $0xe8] sm:$0xff]  ;;  %v1586_v40 = vpack.c.bf16 %v86_v32, %v83_v31 }
  0x16   :  { %1573 = vmatprep.subr.bf16.mxu0 %v1572_v46  ;;  %1757 = vmatprep.subr.bf16.mxu1 %v1756_v11  ;;  %v2203_v39 = vld [vmem:[%s3122_s0] sm:$0xff]  ;;  %v118_v42 = vld [vmem:[%s3123_s1 + $0x298] sm:$0xff]  ;;  %v1588_v45 = vpack.c.bf16 %v93_v34, %v90_v33  ;;  %v89_v46 = vld [vmem:[%s3123_s1 + $0x1b0] sm:$0xff]  ;;  %v1766_v50 = vpack.c.bf16 %v64_v38, %v61_v37 }
  0x17   :  { %v115_v41 = vld [vmem:[%s3123_s1 + $0x280] sm:$0xff]  ;;  %v2213_v43 = vrot.slane %v2203_v39, %v2082_v44  ;;  %v92_v47 = vld [vmem:[%s3123_s1 + $0x1c8] sm:$0xff]  ;;  %v70_v54 = vld [vmem:[%s3123_s1 + $0x118] sm:$0xff] }
  0x18   :  { %v96_v48 = vld [vmem:[%s3123_s1 + $0x1e8] sm:$0xff]  ;;  %v99_v49 = vld [vmem:[%s3123_s1 + $0x200] sm:$0xff]  ;;  %v1768_v52 = vpack.c.bf16 %v118_v42, %v115_v41  ;;  %v1590_v56 = vpack.c.bf16 %v92_v47, %v89_v46  ;;  %v121_v57 = vld [vmem:[%s3123_s1 + $0x2b0] sm:$0xff] }
  0x19   :  { %1575 = vmatpush1.bf16.msra.mxu0 %v1574_v63  ;;  %1759 = vmatpush3.bf16.msra.mxu1 %v1758_v22  ;;  %v363_v51 = vcombine.high %v2213_v43, %v2213_v43  ;;  %v67_v53 = vld [vmem:[%s3123_s1 + $0x100] sm:$0xff]  ;;  %v124_v58 = vld [vmem:[%s3123_s1 + $0x2c8] sm:$0xff]  ;;  %v1592_v60 = vpack.c.bf16 %v99_v49, %v96_v48  ;;  %v98_v62 = vld [vmem:[%s3123_s1 + $0x1f8] sm:$0xff] }
  0x1a   :  { %1577 = vmatprep.subr.bf16.mxu0 %v1576_v2  ;;  %1761 = vmatprep.subr.bf16.mxu1 %v1760_v23  ;;  %v95_v61 = vld [vmem:[%s3123_s1 + $0x1e0] sm:$0xff]  ;;  %v102_v63 = vld [vmem:[%s3123_s1 + $0x218] sm:$0xff]  ;;  %v105_v0 = vld [vmem:[%s3123_s1 + $0x230] sm:$0xff]  ;;  %v1770_v1 = vpack.c.bf16 %v70_v54, %v67_v53  ;;  %v1772_v2 = vpack.c.bf16 %v124_v58, %v121_v57 }
  0x1b   :  { %454 = vmatprep.mubr.f32.mxu0 %v363_v51  ;;  %738 = vmatprep.mubr.f32.mxu1 %v363_v51  ;;  %v73_v3 = vld [vmem:[%s3123_s1 + $0x130] sm:$0xff]  ;;  %v76_v4 = vld [vmem:[%s3123_s1 + $0x148] sm:$0xff]  ;;  %v1594_v5 = vpack.c.bf16 %v98_v62, %v95_v61  ;;  %v127_v6 = vld [vmem:[%s3123_s1 + $0x2e0] sm:$0xff]  ;;  %v1596_v9 = vpack.c.bf16 %v105_v0, %v102_v63 }
  0x1c   :  { %v130_v8 = vld [vmem:[%s3123_s1 + $0x2f8] sm:$0xff]  ;;  %v101_v10 = vld [vmem:[%s3123_s1 + $0x210] sm:$0xff]  ;;  %v104_v11 = vld [vmem:[%s3123_s1 + $0x228] sm:$0xff]  ;;  %v1774_v15 = vpack.c.bf16 %v76_v4, %v73_v3 }
  0x1d   :  { %1579 = vmatpush1.bf16.msra.mxu0 %v1578_v14  ;;  %1763 = vmatpush3.bf16.msra.mxu1 %v1762_v35  ;;  %v108_v12 = vld [vmem:[%s3123_s1 + $0x248] sm:$0xff]  ;;  %v111_v13 = vld [vmem:[%s3123_s1 + $0x260] sm:$0xff]  ;;  %v348_v14 = vcombine.high %v2203_v39, %v2203_v39  ;;  %v1776_v16 = vpack.c.bf16 %v130_v8, %v127_v6  ;;  %v82_v18 = vld [vmem:[%s3123_s1 + $0x178] sm:$0xff]  ;;  %v1598_v19 = vpack.c.bf16 %v104_v11, %v101_v10 }
  0x1e   :  { %1581 = vmatprep.subr.bf16.mxu0 %v1580_v17  ;;  %1765 = vmatprep.subr.bf16.mxu1 %v1764_v36  ;;  %v79_v17 = vld [vmem:[%s3123_s1 + $0x160] sm:$0xff]  ;;  %v181_v20 = vld [vmem:[%s3123_s1 + $0x490] sm:$0xff]  ;;  %v184_v21 = vld [vmem:[%s3123_s1 + $0x4a8] sm:$0xff]  ;;  %v1600_v22 = vpack.c.bf16 %v111_v13, %v108_v12 }
  0x1f   :  { %v107_v23 = vld [vmem:[%s3123_s1 + $0x240] sm:$0xff]  ;;  %v110_v24 = vld [vmem:[%s3123_s1 + $0x258] sm:$0xff]  ;;  %v1778_v27 = vpack.c.bf16 %v82_v18, %v79_v17  ;;  %v2304_v28 = vrot.slane %v348_v14, %v2082_v44  ;;  %v133_v31 = vld [vmem:[%s3123_s1 + $0x310] sm:$0xff] }
  0x20   :  { %v114_v25 = vld [vmem:[%s3123_s1 + $0x278] sm:$0xff]  ;;  %v136_v32 = vld [vmem:[%s3123_s1 + $0x328] sm:$0xff]  ;;  %v1602_v33 = vpack.c.bf16 %v110_v24, %v107_v23  ;;  %v187_v34 = vld [vmem:[%s3123_s1 + $0x4c0] sm:$0xff] }
  0x21   :  { %1583 = vmatpush1.bf16.msra.mxu0 %v1582_v26  ;;  %1767 = vmatpush3.bf16.msra.mxu1 %v1766_v50  ;;  %v117_v26 = vld [vmem:[%s3123_s1 + $0x290] sm:$0xff]  ;;  %v190_v44 = vld [vmem:[%s3123_s1 + $0x4d8] sm:$0xff]  ;;  %v116_v37 = vld [vmem:[%s3123_s1 + $0x288] sm:$0xff]  ;;  %v2332_v41 = vcombine.high %v2304_v28, %v2304_v28 }
  0x22   :  { %1585 = vmatprep.subr.bf16.mxu0 %v1584_v30  ;;  %1769 = vmatprep.subr.bf16.mxu1 %v1768_v52  ;;  %v1780_v30 = vpack.c.bf16 %v184_v21, %v181_v20  ;;  %v1604_v35 = vpack.c.bf16 %v117_v26, %v114_v25  ;;  %v113_v36 = vld [vmem:[%s3123_s1 + $0x270] sm:$0xff]  ;;  %v120_v38 = vld [vmem:[%s3123_s1 + $0x2a8] sm:$0xff]  ;;  %v123_v39 = vld [vmem:[%s3123_s1 + $0x2c0] sm:$0xff]  ;;  %v1784_v42 = vpack.c.bf16 %v190_v44, %v187_v34 }
  0x23   :  { %v142_v46 = vld [vmem:[%s3123_s1 + $0x358] sm:$0xff]  ;;  %v1606_v47 = vpack.c.bf16 %v116_v37, %v113_v36  ;;  %v193_v48 = vld [vmem:[%s3123_s1 + $0x4f0] sm:$0xff]  ;;  %v196_v49 = vld [vmem:[%s3123_s1 + $0x508] sm:$0xff]  ;;  %v1608_v50 = vpack.c.bf16 %v123_v39, %v120_v38 }
  0x24   :  { %v119_v51 = vld [vmem:[%s3123_s1 + $0x2a0] sm:$0xff]  ;;  %v122_v52 = vld [vmem:[%s3123_s1 + $0x2b8] sm:$0xff]  ;;  %v129_v54 = vld [vmem:[%s3123_s1 + $0x2f0] sm:$0xff]  ;;  %v1788_v57 = vpack.c.bf16 %v196_v49, %v193_v48 }
  0x25   :  { %1587 = vmatpush1.bf16.msra.mxu0 %v1586_v40  ;;  %1771 = vmatpush3.bf16.msra.mxu1 %v1770_v1  ;;  %v1782_v40 = vpack.c.bf16 %v136_v32, %v133_v31  ;;  %v126_v53 = vld [vmem:[%s3123_s1 + $0x2d8] sm:$0xff]  ;;  %v145_v58 = vld [vmem:[%s3123_s1 + $0x370] sm:$0xff]  ;;  %v1610_v61 = vpack.c.bf16 %v122_v52, %v119_v51  ;;  %v199_v62 = vld [vmem:[%s3123_s1 + $0x520] sm:$0xff] }
  0x26   :  { %1589 = vmatprep.subr.bf16.mxu0 %v1588_v45  ;;  %1773 = vmatprep.subr.bf16.mxu1 %v1772_v2  ;;  %v139_v45 = vld [vmem:[%s3123_s1 + $0x340] sm:$0xff]  ;;  %v202_v63 = vld [vmem:[%s3123_s1 + $0x538] sm:$0xff]  ;;  %v1612_v0 = vpack.c.bf16 %v129_v54, %v126_v53  ;;  %v125_v1 = vld [vmem:[%s3123_s1 + $0x2d0] sm:$0xff] }
  0x27   :  { %v128_v2 = vld [vmem:[%s3123_s1 + $0x2e8] sm:$0xff]  ;;  %v135_v4 = vld [vmem:[%s3123_s1 + $0x320] sm:$0xff]  ;;  %v1792_v6 = vpack.c.bf16 %v202_v63, %v199_v62  ;;  %v205_v11 = vld [vmem:[%s3123_s1 + $0x550] sm:$0xff] }
  0x28   :  { %v132_v3 = vld [vmem:[%s3123_s1 + $0x308] sm:$0xff]  ;;  %v151_v8 = vld [vmem:[%s3123_s1 + $0x3a0] sm:$0xff]  ;;  %v1614_v10 = vpack.c.bf16 %v128_v2, %v125_v1  ;;  %v141_v17 = vld [vmem:[%s3123_s1 + $0x350] sm:$0xff] }
  0x29   :  { %1591 = vmatpush1.bf16.msra.mxu0 %v1590_v56  ;;  %1775 = vmatpush3.bf16.msra.mxu1 %v1774_v15  ;;  %v1786_v56 = vpack.c.bf16 %v142_v46, %v139_v45  ;;  %v208_v12 = vld [vmem:[%s3123_s1 + $0x568] sm:$0xff]  ;;  %v1616_v13 = vpack.c.bf16 %v135_v4, %v132_v3  ;;  %v131_v14 = vld [vmem:[%s3123_s1 + $0x300] sm:$0xff]  ;;  %v134_v15 = vld [vmem:[%s3123_s1 + $0x318] sm:$0xff] }
  0x2a   :  { %1593 = vmatprep.subr.bf16.mxu0 %v1592_v60  ;;  %1777 = vmatprep.subr.bf16.mxu1 %v1776_v16  ;;  %v148_v60 = vld [vmem:[%s3123_s1 + $0x388] sm:$0xff]  ;;  %v138_v16 = vld [vmem:[%s3123_s1 + $0x338] sm:$0xff]  ;;  %v157_v20 = vld [vmem:[%s3123_s1 + $0x3d0] sm:$0xff] }
  0x2b   :  { %v160_v21 = vld [vmem:[%s3123_s1 + $0x3e8] sm:$0xff]  ;;  %v211_v23 = vld [vmem:[%s3123_s1 + $0x580] sm:$0xff]  ;;  %v214_v24 = vld [vmem:[%s3123_s1 + $0x598] sm:$0xff]  ;;  %v1620_v25 = vpack.c.bf16 %v141_v17, %v138_v16 }
  0x2c   :  { %v137_v26 = vld [vmem:[%s3123_s1 + $0x330] sm:$0xff]  ;;  %v147_v31 = vld [vmem:[%s3123_s1 + $0x380] sm:$0xff]  ;;  %v1798_v32 = vpack.c.bf16 %v160_v21, %v157_v20  ;;  %v166_v44 = vld [vmem:[%s3123_s1 + $0x418] sm:$0xff]  ;;  %v2532_v20 = vcombine.high %v2103_v55, %v2103_v55 }
  0x2d   :  { %1595 = vmatpush1.bf16.msra.mxu0 %v1594_v5  ;;  %1779 = vmatpush3.bf16.msra.mxu1 %v1778_v27  ;;  %v1790_v5 = vpack.c.bf16 %v148_v60, %v145_v58  ;;  %v140_v27 = vld [vmem:[%s3123_s1 + $0x348] sm:$0xff]  ;;  %v163_v34 = vld [vmem:[%s3123_s1 + $0x400] sm:$0xff]  ;;  %v217_v36 = vld [vmem:[%s3123_s1 + $0x5b0] sm:$0xff] }
  0x2e   :  { %1597 = vmatprep.subr.bf16.mxu0 %v1596_v9  ;;  %1781 = vmatprep.subr.bf16.mxu1 %v1780_v30  ;;  %v154_v9 = vld [vmem:[%s3123_s1 + $0x3b8] sm:$0xff]  ;;  %v144_v30 = vld [vmem:[%s3123_s1 + $0x368] sm:$0xff]  ;;  %v143_v38 = vld [vmem:[%s3123_s1 + $0x360] sm:$0xff] }
  0x2f   :  { %v1794_v18 = vpack.c.bf16 %v154_v9, %v151_v8  ;;  %v1624_v37 = vpack.c.bf16 %v147_v31, %v144_v30  ;;  %v146_v39 = vld [vmem:[%s3123_s1 + $0x378] sm:$0xff]  ;;  %v169_v46 = vld [vmem:[%s3123_s1 + $0x430] sm:$0xff]  ;;  %v223_v49 = vld [vmem:[%s3123_s1 + $0x5e0] sm:$0xff] }
  0x30   :  { %739 = vmatmul.mubr.f32.vlgmr.msra.gmra.mrb[2].mxu1 %v2213_v43  ;;  %v1626_v48 = vpack.c.bf16 %v146_v39, %v143_v38  ;;  %v149_v52 = vld [vmem:[%s3123_s1 + $0x390] sm:$0xff]  ;;  %v152_v53 = vld [vmem:[%s3123_s1 + $0x3a8] sm:$0xff]  ;;  %v175_v60 = vld [vmem:[%s3123_s1 + $0x460] sm:$0xff] }
  0x31   :  { %1599 = vmatpush1.bf16.msra.mxu0 %v1598_v19  ;;  %1783 = vmatpush3.bf16.msra.mxu1 %v1782_v40  ;;  %v1796_v19 = vpack.c.bf16 %v208_v12, %v205_v11  ;;  %v150_v40 = vld [vmem:[%s3123_s1 + $0x398] sm:$0xff]  ;;  %v156_v54 = vld [vmem:[%s3123_s1 + $0x3c8] sm:$0xff]  ;;  %v1630_v62 = vpack.c.bf16 %v152_v53, %v149_v52  ;;  %v277_v63 = vld [vmem:[%s3123_s1 + $0x790] sm:$0xff] }
  0x32   :  { %1601 = vmatprep.subr.bf16.mxu0 %v1600_v22  ;;  %808 = vmatprep.mubr.f32.mxu1 %v2332_v41  ;;  %v1618_v22 = vpack.c.bf16 %v134_v15, %v131_v14  ;;  %v155_v2 = vld [vmem:[%s3123_s1 + $0x3c0] sm:$0xff]  ;;  %v158_v3 = vld [vmem:[%s3123_s1 + $0x3d8] sm:$0xff]  ;;  %v229_v9 = vld [vmem:[%s3123_s1 + $0x610] sm:$0xff] }
  0x33   :  { %1785 = vmatprep.subr.bf16.mxu1 %v1784_v42  ;;  %v153_v42 = vld [vmem:[%s3123_s1 + $0x3b0] sm:$0xff]  ;;  %v162_v4 = vld [vmem:[%s3123_s1 + $0x3f8] sm:$0xff]  ;;  %v1634_v11 = vpack.c.bf16 %v158_v3, %v155_v2  ;;  %v283_v12 = vld [vmem:[%s3123_s1 + $0x7c0] sm:$0xff] }
  0x34   :  { %v1628_v51 = vpack.c.bf16 %v153_v42, %v150_v40  ;;  %v161_v15 = vld [vmem:[%s3123_s1 + $0x3f0] sm:$0xff]  ;;  %v164_v16 = vld [vmem:[%s3123_s1 + $0x408] sm:$0xff]  ;;  %v167_v30 = vld [vmem:[%s3123_s1 + $0x420] sm:$0xff] }
  0x35   :  { %1603 = vmatpush1.bf16.msra.mxu0 %v1602_v33  ;;  %1787 = vmatpush3.bf16.msra.mxu1 %v1786_v56  ;;  %v1800_v33 = vpack.c.bf16 %v214_v24, %v211_v23  ;;  %v159_v56 = vld [vmem:[%s3123_s1 + $0x3e0] sm:$0xff]  ;;  %v168_v17 = vld [vmem:[%s3123_s1 + $0x428] sm:$0xff]  ;;  %v238_v23 = vld [vmem:[%s3123_s1 + $0x658] sm:$0xff]  ;;  %v1638_v24 = vpack.c.bf16 %v164_v16, %v161_v15 }
  0x36   :  { %1605 = vmatprep.subr.bf16.mxu0 %v1604_v35  ;;  %1789 = vmatprep.subr.bf16.mxu1 %v1788_v57  ;;  %v1622_v35 = vpack.c.bf16 %v140_v27, %v137_v26  ;;  %v1632_v1 = vpack.c.bf16 %v159_v56, %v156_v54  ;;  %v292_v26 = vld [vmem:[%s3123_s1 + $0x808] sm:$0xff]  ;;  %v170_v31 = vld [vmem:[%s3123_s1 + $0x438] sm:$0xff]  ;;  %v173_v40 = vld [vmem:[%s3123_s1 + $0x450] sm:$0xff] }
  0x37   :  { %v298_v38 = vld [vmem:[%s3123_s1 + $0x838] sm:$0xff]  ;;  %v176_v42 = vld [vmem:[%s3123_s1 + $0x468] sm:$0xff]  ;;  %v179_v54 = vld [vmem:[%s3123_s1 + $0x480] sm:$0xff] }
  0x38   :  { %v304_v52 = vld [vmem:[%s3123_s1 + $0x868] sm:$0xff]  ;;  %v182_v56 = vld [vmem:[%s3123_s1 + $0x498] sm:$0xff] }
  0x39   :  { %1607 = vmatpush1.bf16.msra.mxu0 %v1606_v47  ;;  %1791 = vmatpush3.bf16.msra.mxu1 %v1790_v5  ;;  %v172_v47 = vld [vmem:[%s3123_s1 + $0x448] sm:$0xff]  ;;  %v165_v5 = vld [vmem:[%s3123_s1 + $0x410] sm:$0xff]  ;;  %v310_v2 = vld [vmem:[%s3123_s1 + $0x898] sm:$0xff] }
  0x3a   :  { %1609 = vmatprep.subr.bf16.mxu0 %v1608_v50  ;;  %1793 = vmatprep.subr.bf16.mxu1 %v1792_v6  ;;  %v226_v50 = vld [vmem:[%s3123_s1 + $0x5f8] sm:$0xff]  ;;  %v1806_v57 = vpack.c.bf16 %v172_v47, %v169_v46  ;;  %v1636_v14 = vpack.c.bf16 %v165_v5, %v162_v4  ;;  %v185_v4 = vld [vmem:[%s3123_s1 + $0x4b0] sm:$0xff]  ;;  %v188_v5 = vld [vmem:[%s3123_s1 + $0x4c8] sm:$0xff] }
  0x3b   :  { %v1808_v58 = vpack.c.bf16 %v226_v50, %v223_v49  ;;  %v250_v49 = vld [vmem:[%s3123_s1 + $0x6b8] sm:$0xff]  ;;  %v1646_v50 = vpack.c.bf16 %v176_v42, %v173_v40 }
  0x3d   :  { %1611 = vmatpush1.bf16.msra.mxu0 %v1610_v61  ;;  %1795 = vmatpush3.bf16.msra.mxu1 %v1794_v18  ;;  %v178_v61 = vld [vmem:[%s3123_s1 + $0x478] sm:$0xff]  ;;  %v171_v18 = vld [vmem:[%s3123_s1 + $0x440] sm:$0xff] }
  0x3e   :  { %1613 = vmatprep.subr.bf16.mxu0 %v1612_v0  ;;  %1797 = vmatprep.subr.bf16.mxu1 %v1796_v19  ;;  %v280_v0 = vld [vmem:[%s3123_s1 + $0x7a8] sm:$0xff]  ;;  %v1810_v6 = vpack.c.bf16 %v178_v61, %v175_v60  ;;  %v1640_v27 = vpack.c.bf16 %v171_v18, %v168_v17 }
  0x3f   :  { %v1812_v8 = vpack.c.bf16 %v280_v0, %v277_v63  ;;  %v256_v63 = vld [vmem:[%s3123_s1 + $0x6e8] sm:$0xff]  ;;  %v1650_v0 = vpack.c.bf16 %v182_v56, %v179_v54 }
  0x41   :  { %1615 = vmatpush1.bf16.msra.mxu0 %v1614_v10  ;;  %1799 = vmatpush3.bf16.msra.mxu1 %v1798_v32  ;;  %v232_v10 = vld [vmem:[%s3123_s1 + $0x628] sm:$0xff]  ;;  %v174_v32 = vld [vmem:[%s3123_s1 + $0x458] sm:$0xff] }
  0x42   :  { %1617 = vmatprep.subr.bf16.mxu0 %v1616_v13  ;;  %1801 = vmatprep.subr.bf16.mxu1 %v1800_v33  ;;  %v286_v13 = vld [vmem:[%s3123_s1 + $0x7d8] sm:$0xff]  ;;  %v1814_v19 = vpack.c.bf16 %v232_v10, %v229_v9  ;;  %v177_v33 = vld [vmem:[%s3123_s1 + $0x470] sm:$0xff] }
  0x43   :  { %v1816_v21 = vpack.c.bf16 %v286_v13, %v283_v12  ;;  %v1644_v39 = vpack.c.bf16 %v177_v33, %v174_v32 }
  0x44   :  { %455 = vmatmul.mubr.f32.vlgmr.msra.gmra.mrb[0].mxu0 %v2213_v43  ;;  %v220_v43 = vld [vmem:[%s3123_s1 + $0x5c8] sm:$0xff] }
  0x45   :  { %1619 = vmatpush1.bf16.msra.mxu0 %v1618_v22  ;;  %525 = vmatprep.mubr.f32.mxu0 %v2332_v41  ;;  %v1802_v41 = vpack.c.bf16 %v166_v44, %v163_v34  ;;  %v1804_v45 = vpack.c.bf16 %v220_v43, %v217_v36  ;;  %v235_v22 = vld [vmem:[%s3123_s1 + $0x640] sm:$0xff]  ;;  %v244_v36 = vld [vmem:[%s3123_s1 + $0x688] sm:$0xff]  ;;  %v1642_v43 = vpack.c.bf16 %v170_v31, %v167_v30 }
  0x46   :  { %1621 = vmatprep.subr.bf16.mxu0 %v1620_v25  ;;  %v289_v25 = vld [vmem:[%s3123_s1 + $0x7f0] sm:$0xff]  ;;  %v1818_v34 = vpack.c.bf16 %v238_v23, %v235_v22 }
  0x47   :  { %1803 = vmatpush3.bf16.msra.mxu1 %v1802_v41  ;;  %v1820_v44 = vpack.c.bf16 %v292_v26, %v289_v25  ;;  %v180_v41 = vld [vmem:[%s3123_s1 + $0x488] sm:$0xff] }
  0x48   :  { %1805 = vmatprep.subr.bf16.mxu1 %v1804_v45  ;;  %v183_v45 = vld [vmem:[%s3123_s1 + $0x4a0] sm:$0xff] }
  0x49   :  { %1623 = vmatpush1.bf16.msra.mxu0 %v1622_v35  ;;  %v241_v35 = vld [vmem:[%s3123_s1 + $0x670] sm:$0xff]  ;;  %v1648_v53 = vpack.c.bf16 %v183_v45, %v180_v41 }
  0x4a   :  { %1625 = vmatprep.subr.bf16.mxu0 %v1624_v37  ;;  %v295_v37 = vld [vmem:[%s3123_s1 + $0x820] sm:$0xff]  ;;  %v1822_v46 = vpack.c.bf16 %v244_v36, %v241_v35 }
  0x4b   :  { %1807 = vmatpush3.bf16.msra.mxu1 %v1806_v57  ;;  %v1824_v47 = vpack.c.bf16 %v298_v38, %v295_v37  ;;  %v186_v57 = vld [vmem:[%s3123_s1 + $0x4b8] sm:$0xff] }
  0x4c   :  { %1809 = vmatprep.subr.bf16.mxu1 %v1808_v58  ;;  %v189_v58 = vld [vmem:[%s3123_s1 + $0x4d0] sm:$0xff] }
  0x4d   :  { %1627 = vmatpush1.bf16.msra.mxu0 %v1626_v48  ;;  %v247_v48 = vld [vmem:[%s3123_s1 + $0x6a0] sm:$0xff]  ;;  %v1652_v3 = vpack.c.bf16 %v189_v58, %v186_v57 }
  0x4e   :  { %1629 = vmatprep.subr.bf16.mxu0 %v1628_v51  ;;  %v301_v51 = vld [vmem:[%s3123_s1 + $0x850] sm:$0xff]  ;;  %v1826_v60 = vpack.c.bf16 %v250_v49, %v247_v48 }
  0x4f   :  { %1811 = vmatpush3.bf16.msra.mxu1 %v1810_v6  ;;  %v1828_v61 = vpack.c.bf16 %v304_v52, %v301_v51  ;;  %v192_v6 = vld [vmem:[%s3123_s1 + $0x4e8] sm:$0xff] }
  0x50   :  { %1813 = vmatprep.subr.bf16.mxu1 %v1812_v8  ;;  %v195_v8 = vld [vmem:[%s3123_s1 + $0x500] sm:$0xff] }
  0x51   :  { %1631 = vmatpush1.bf16.msra.mxu0 %v1630_v62  ;;  %v253_v62 = vld [vmem:[%s3123_s1 + $0x6d0] sm:$0xff] }
  0x52   :  { %1633 = vmatprep.subr.bf16.mxu0 %v1632_v1  ;;  %809 = vmatmul.mubr.f32.vlgmr.msra.gmra.mrb[4].mxu1 %v2304_v28  ;;  %v307_v1 = vld [vmem:[%s3123_s1 + $0x880] sm:$0xff]  ;;  %v1830_v9 = vpack.c.bf16 %v256_v63, %v253_v62 }
  0x53   :  { %1815 = vmatpush3.bf16.msra.mxu1 %v1814_v19  ;;  %878 = vmatprep.mubr.f32.mxu1 %v2532_v20 }
  0x54   :  { %1817 = vmatprep.subr.bf16.mxu1 %v1816_v21 }
  0x55   :  { %1635 = vmatpush1.bf16.msra.mxu0 %v1634_v11 }
  0x56   :  { %1637 = vmatprep.subr.bf16.mxu0 %v1636_v14 }
  0x57   :  { %1819 = vmatpush3.bf16.msra.mxu1 %v1818_v34 }
  0x58   :  { %1821 = vmatprep.subr.bf16.mxu1 %v1820_v44 }
  0x59   :  { %1639 = vmatpush1.bf16.msra.mxu0 %v1638_v24 }
  0x5a   :  { %1641 = vmatprep.subr.bf16.mxu0 %v1640_v27 }
  0x5b   :  { %1823 = vmatpush3.bf16.msra.mxu1 %v1822_v46 }
  0x5c   :  { %1825 = vmatprep.subr.bf16.mxu1 %v1824_v47 }
  0x5d   :  { %1643 = vmatpush1.bf16.msra.mxu0 %v1642_v43 }
  0x5e   :  { %1645 = vmatprep.subr.bf16.mxu0 %v1644_v39 }
  0x5f   :  { %1827 = vmatpush3.bf16.msra.mxu1 %v1826_v60 }
  0x61   :  { %1647 = vmatpush1.bf16.msra.mxu0 %v1646_v50 }
  0x62   :  { %1649 = vmatprep.subr.bf16.mxu0 %v1648_v53 }
  0x63   :  { %14 = vsyncpa [#allocation3], 0  ;;  %1829 = vmatprep.subr.bf16.mxu1 %v1828_v61  ;;  %v1832_v10 = vpack.c.bf16 %v310_v2, %v307_v1  ;;  %v259_v11 = vld [vmem:[%s3123_s1 + $0x700] sm:$0xff]  ;;  %v262_v12 = vld [vmem:[%s3123_s1 + $0x718] sm:$0xff]  ;;  %v1654_v13 = vpack.c.bf16 %v188_v5, %v185_v4  ;;  %v1656_v16 = vpack.c.bf16 %v195_v8, %v192_v6  ;;  %v1944_v57 = vmov 0.0|0.0  }
  0x64   :  { %v313_v14 = vld [vmem:[%s3123_s1 + $0x8b0] sm:$0xff]  ;;  %v316_v15 = vld [vmem:[%s3123_s1 + $0x8c8] sm:$0xff]  ;;  %v191_v17 = vld [vmem:[%s3123_s1 + $0x4e0] sm:$0xff]  ;;  %1831 = vmatpush3.bf16.msra.mxu1 %v1830_v9  ;;  %v1834_v22 = vpack.c.bf16 %v262_v12, %v259_v11  ;;  %vm1945_vm1 = vmmov 0   ;;  %vm1000_vm2 = vcmask 261120   ;;  %vm1158_vm3 = vcmask 392192  }
  0x65   :  { %1651 = vmatpush1.bf16.msra.mxu0 %v1650_v0  ;;  %v194_v18 = vld [vmem:[%s3123_s1 + $0x4f8] sm:$0xff]  ;;  %v201_v21 = vld [vmem:[%s3123_s1 + $0x530] sm:$0xff]  ;;  %1833 = vmatprep.subr.bf16.mxu1 %v1832_v10  ;;  %v1836_v23 = vpack.c.bf16 %v316_v15, %v313_v14  ;;  %v268_v25 = vld [vmem:[%s3123_s1 + $0x748] sm:$0xff] }
  0x66   :  { %1653 = vmatprep.subr.bf16.mxu0 %v1652_v3  ;;  %v198_v19 = vld [vmem:[%s3123_s1 + $0x518] sm:$0xff]  ;;  %v265_v24 = vld [vmem:[%s3123_s1 + $0x730] sm:$0xff]  ;;  %v1658_v26 = vpack.c.bf16 %v194_v18, %v191_v17  ;;  %v319_v27 = vld [vmem:[%s3123_s1 + $0x8e0] sm:$0xff] }
  0x67   :  { %v322_v30 = vld [vmem:[%s3123_s1 + $0x8f8] sm:$0xff]  ;;  %v1660_v31 = vpack.c.bf16 %v201_v21, %v198_v19  ;;  %v197_v32 = vld [vmem:[%s3123_s1 + $0x510] sm:$0xff]  ;;  %v200_v33 = vld [vmem:[%s3123_s1 + $0x528] sm:$0xff]  ;;  %v1838_v35 = vpack.c.bf16 %v268_v25, %v265_v24 }
  0x68   :  { %v204_v34 = vld [vmem:[%s3123_s1 + $0x548] sm:$0xff]  ;;  %v207_v44 = vld [vmem:[%s3123_s1 + $0x560] sm:$0xff]  ;;  %1835 = vmatpush3.bf16.msra.mxu1 %v1834_v22  ;;  %v1840_v36 = vpack.c.bf16 %v322_v30, %v319_v27  ;;  %v274_v37 = vld [vmem:[%s3123_s1 + $0x778] sm:$0xff]  ;;  %v1662_v38 = vpack.c.bf16 %v200_v33, %v197_v32 }
  0x69   :  { %1655 = vmatpush1.bf16.msra.mxu0 %v1654_v13  ;;  %1837 = vmatprep.subr.bf16.mxu1 %v1836_v23  ;;  %v271_v43 = vld [vmem:[%s3123_s1 + $0x760] sm:$0xff]  ;;  %v1664_v39 = vpack.c.bf16 %v207_v44, %v204_v34  ;;  %v206_v42 = vld [vmem:[%s3123_s1 + $0x558] sm:$0xff]  ;;  %v213_v45 = vld [vmem:[%s3123_s1 + $0x590] sm:$0xff] }
  0x6a   :  { %1657 = vmatprep.subr.bf16.mxu0 %v1656_v16  ;;  %v203_v40 = vld [vmem:[%s3123_s1 + $0x540] sm:$0xff]  ;;  %v210_v41 = vld [vmem:[%s3123_s1 + $0x578] sm:$0xff]  ;;  %v1842_v46 = vpack.c.bf16 %v274_v37, %v271_v43  ;;  %v325_v47 = vld [vmem:[%s3123_s1 + $0x910] sm:$0xff] }
  0x6b   :  { %v328_v48 = vld [vmem:[%s3123_s1 + $0x928] sm:$0xff]  ;;  %v1666_v49 = vpack.c.bf16 %v206_v42, %v203_v40  ;;  %v1668_v50 = vpack.c.bf16 %v213_v45, %v210_v41  ;;  %v209_v51 = vld [vmem:[%s3123_s1 + $0x570] sm:$0xff]  ;;  %v219_v54 = vld [vmem:[%s3123_s1 + $0x5c0] sm:$0xff] }
  0x6c   :  { %1839 = vmatpush3.bf16.msra.mxu1 %v1838_v35  ;;  %v212_v52 = vld [vmem:[%s3123_s1 + $0x588] sm:$0xff]  ;;  %v1845_v56 = vpack.c.bf16 %v328_v48, %v325_v47  ;;  %v215_v61 = vld [vmem:[%s3123_s1 + $0x5a0] sm:$0xff]  ;;  %v218_v62 = vld [vmem:[%s3123_s1 + $0x5b8] sm:$0xff] }
  0x6d   :  { %1659 = vmatpush1.bf16.msra.mxu0 %v1658_v26  ;;  %1841 = vmatprep.subr.bf16.mxu1 %v1840_v36  ;;  %v216_v53 = vld [vmem:[%s3123_s1 + $0x5a8] sm:$0xff]  ;;  %v1670_v58 = vpack.c.bf16 %v212_v52, %v209_v51  ;;  %v222_v63 = vld [vmem:[%s3123_s1 + $0x5d8] sm:$0xff]  ;;  %v225_v0 = vld [vmem:[%s3123_s1 + $0x5f0] sm:$0xff]  ;;  %v1674_v1 = vpack.c.bf16 %v218_v62, %v215_v61 }
  0x6e   :  { %1661 = vmatprep.subr.bf16.mxu0 %v1660_v31  ;;  %v1672_v60 = vpack.c.bf16 %v219_v54, %v216_v53  ;;  %v1676_v2 = vpack.c.bf16 %v225_v0, %v222_v63  ;;  %v221_v3 = vld [vmem:[%s3123_s1 + $0x5d0] sm:$0xff]  ;;  %v224_v4 = vld [vmem:[%s3123_s1 + $0x5e8] sm:$0xff]  ;;  %v231_v6 = vld [vmem:[%s3123_s1 + $0x620] sm:$0xff] }
  0x6f   :  { %v228_v5 = vld [vmem:[%s3123_s1 + $0x608] sm:$0xff]  ;;  %v1678_v8 = vpack.c.bf16 %v224_v4, %v221_v3  ;;  %v227_v10 = vld [vmem:[%s3123_s1 + $0x600] sm:$0xff]  ;;  %v234_v11 = vld [vmem:[%s3123_s1 + $0x638] sm:$0xff] }
  0x70   :  { %1843 = vmatpush3.bf16.msra.mxu1 %v1842_v46  ;;  %v1680_v9 = vpack.c.bf16 %v231_v6, %v228_v5  ;;  %v237_v12 = vld [vmem:[%s3123_s1 + $0x650] sm:$0xff]  ;;  %v236_v16 = vld [vmem:[%s3123_s1 + $0x648] sm:$0xff]  ;;  %v243_v18 = vld [vmem:[%s3123_s1 + $0x680] sm:$0xff] }
  0x71   :  { %1663 = vmatpush1.bf16.msra.mxu0 %v1662_v38  ;;  %1844 = vmatprep.subr.bf16.mxu1 %v1944_v57  ;;  %v1684_v14 = vpack.c.bf16 %v237_v12, %v234_v11  ;;  %v233_v15 = vld [vmem:[%s3123_s1 + $0x630] sm:$0xff]  ;;  %v240_v17 = vld [vmem:[%s3123_s1 + $0x668] sm:$0xff]  ;;  %v239_v22 = vld [vmem:[%s3123_s1 + $0x660] sm:$0xff] }
  0x72   :  { %1665 = vmatprep.subr.bf16.mxu0 %v1664_v39  ;;  %v1686_v19 = vpack.c.bf16 %v236_v16, %v233_v15  ;;  %v1688_v21 = vpack.c.bf16 %v243_v18, %v240_v17  ;;  %v242_v23 = vld [vmem:[%s3123_s1 + $0x678] sm:$0xff]  ;;  %v245_v26 = vld [vmem:[%s3123_s1 + $0x690] sm:$0xff]  ;;  %v248_v27 = vld [vmem:[%s3123_s1 + $0x6a8] sm:$0xff] }
  0x73   :  { %879 = vmatmul.mubr.f32.vlgmr.msra.gmra.mrb[6].mxu1 %v2103_v55  ;;  %v246_v24 = vld [vmem:[%s3123_s1 + $0x698] sm:$0xff]  ;;  %v252_v30 = vld [vmem:[%s3123_s1 + $0x6c8] sm:$0xff]  ;;  %v255_v31 = vld [vmem:[%s3123_s1 + $0x6e0] sm:$0xff]  ;;  %v1694_v32 = vpack.c.bf16 %v248_v27, %v245_v26 }
  0x74   :  { %1846 = vmatpush3.bf16.msra.mxu1 %v1845_v56  ;;  %1508 = vmatprep.mubr.msk.f32.mxu1 %vm1945_vm1, %v1942_v7  ;;  %v1696_v33 = vpack.c.bf16 %v255_v31, %v252_v30  ;;  %v251_v34 = vld [vmem:[%s3123_s1 + $0x6c0] sm:$0xff]  ;;  %v254_v44 = vld [vmem:[%s3123_s1 + $0x6d8] sm:$0xff]  ;;  %v261_v36 = vld [vmem:[%s3123_s1 + $0x710] sm:$0xff] }
  0x75   :  { %1667 = vmatpush1.bf16.msra.mxu0 %v1666_v49  ;;  %v258_v35 = vld [vmem:[%s3123_s1 + $0x6f8] sm:$0xff]  ;;  %v1698_v43 = vpack.c.bf16 %v254_v44, %v251_v34  ;;  %v257_v38 = vld [vmem:[%s3123_s1 + $0x6f0] sm:$0xff]  ;;  %v260_v39 = vld [vmem:[%s3123_s1 + $0x708] sm:$0xff] }
  0x76   :  { %1669 = vmatprep.subr.bf16.mxu0 %v1668_v50  ;;  %v1700_v37 = vpack.c.bf16 %v261_v36, %v258_v35  ;;  %v264_v40 = vld [vmem:[%s3123_s1 + $0x728] sm:$0xff]  ;;  %v267_v42 = vld [vmem:[%s3123_s1 + $0x740] sm:$0xff]  ;;  %v1702_v41 = vpack.c.bf16 %v260_v39, %v257_v38  ;;  %v266_v47 = vld [vmem:[%s3123_s1 + $0x738] sm:$0xff] }
  0x77   :  { %1509 = vmatmul.mubr.msk.f32.vlgmr.msra.gmra.mrb[8].mxu1 %vm387_vm0, %v2112_v59  ;;  %v230_v59 = vld [vmem:[%s3123_s1 + $0x618] sm:$0xff]  ;;  %v1704_v45 = vpack.c.bf16 %v267_v42, %v264_v40  ;;  %v263_v46 = vld [vmem:[%s3123_s1 + $0x720] sm:$0xff]  ;;  %v273_v49 = vld [vmem:[%s3123_s1 + $0x770] sm:$0xff] }
  0x78   :  { %v1682_v13 = vpack.c.bf16 %v230_v59, %v227_v10  ;;  %v270_v48 = vld [vmem:[%s3123_s1 + $0x758] sm:$0xff]  ;;  %v1706_v50 = vpack.c.bf16 %v266_v47, %v263_v46  ;;  %v269_v52 = vld [vmem:[%s3123_s1 + $0x750] sm:$0xff]  ;;  %v272_v53 = vld [vmem:[%s3123_s1 + $0x768] sm:$0xff] }
  0x79   :  { %1671 = vmatpush1.bf16.msra.mxu0 %v1670_v58  ;;  %v1708_v51 = vpack.c.bf16 %v273_v49, %v270_v48  ;;  %v276_v54 = vld [vmem:[%s3123_s1 + $0x788] sm:$0xff]  ;;  %v279_v56 = vld [vmem:[%s3123_s1 + $0x7a0] sm:$0xff]  ;;  %v1710_v58 = vpack.c.bf16 %v272_v53, %v269_v52  ;;  %v278_v62 = vld [vmem:[%s3123_s1 + $0x798] sm:$0xff] }
  0x7a   :  { %1673 = vmatprep.subr.bf16.mxu0 %v1672_v60  ;;  %v1712_v60 = vpack.c.bf16 %v279_v56, %v276_v54  ;;  %v275_v61 = vld [vmem:[%s3123_s1 + $0x780] sm:$0xff]  ;;  %v282_v63 = vld [vmem:[%s3123_s1 + $0x7b8] sm:$0xff]  ;;  %v285_v0 = vld [vmem:[%s3123_s1 + $0x7d0] sm:$0xff] }
  0x7b   :  { %v281_v3 = vld [vmem:[%s3123_s1 + $0x7b0] sm:$0xff]  ;;  %v284_v4 = vld [vmem:[%s3123_s1 + $0x7c8] sm:$0xff]  ;;  %v291_v6 = vld [vmem:[%s3123_s1 + $0x800] sm:$0xff] }
  0x7c   :  { %v288_v5 = vld [vmem:[%s3123_s1 + $0x7e8] sm:$0xff]  ;;  %v287_v10 = vld [vmem:[%s3123_s1 + $0x7e0] sm:$0xff]  ;;  %v290_v59 = vld [vmem:[%s3123_s1 + $0x7f8] sm:$0xff] }
  0x7d   :  { %1675 = vmatpush1.bf16.msra.mxu0 %v1674_v1  ;;  %v1714_v1 = vpack.c.bf16 %v278_v62, %v275_v61  ;;  %v294_v11 = vld [vmem:[%s3123_s1 + $0x818] sm:$0xff]  ;;  %v297_v12 = vld [vmem:[%s3123_s1 + $0x830] sm:$0xff]  ;;  %v296_v16 = vld [vmem:[%s3123_s1 + $0x828] sm:$0xff] }
  0x7e   :  { %1677 = vmatprep.subr.bf16.mxu0 %v1676_v2  ;;  %v1716_v2 = vpack.c.bf16 %v285_v0, %v282_v63  ;;  %v293_v15 = vld [vmem:[%s3123_s1 + $0x810] sm:$0xff]  ;;  %v300_v17 = vld [vmem:[%s3123_s1 + $0x848] sm:$0xff]  ;;  %v303_v18 = vld [vmem:[%s3123_s1 + $0x860] sm:$0xff] }
  0x7f   :  { %v305_v26 = vld [vmem:[%s3123_s1 + $0x870] sm:$0xff]  ;;  %v308_v27 = vld [vmem:[%s3123_s1 + $0x888] sm:$0xff]  ;;  %v315_v31 = vld [vmem:[%s3123_s1 + $0x8c0] sm:$0xff] }
  0x80   :  { %v312_v30 = vld [vmem:[%s3123_s1 + $0x8a8] sm:$0xff]  ;;  %v311_v34 = vld [vmem:[%s3123_s1 + $0x8a0] sm:$0xff]  ;;  %v314_v44 = vld [vmem:[%s3123_s1 + $0x8b8] sm:$0xff] }
  0x81   :  { %1679 = vmatpush1.bf16.msra.mxu0 %v1678_v8  ;;  %v1718_v8 = vpack.c.bf16 %v284_v4, %v281_v3  ;;  %v318_v35 = vld [vmem:[%s3123_s1 + $0x8d8] sm:$0xff]  ;;  %v321_v36 = vld [vmem:[%s3123_s1 + $0x8f0] sm:$0xff]  ;;  %v320_v39 = vld [vmem:[%s3123_s1 + $0x8e8] sm:$0xff] }
  0x82   :  { %1681 = vmatprep.subr.bf16.mxu0 %v1680_v9  ;;  %v1720_v9 = vpack.c.bf16 %v291_v6, %v288_v5  ;;  %v317_v38 = vld [vmem:[%s3123_s1 + $0x8d0] sm:$0xff]  ;;  %v973_v42 = vld [vmem:[%s3125_s3 + $0x80] sm:$0xff]  ;;  %v958_v47 = vld [vmem:[%s3125_s3 + $0x8] sm:$0xff] }
  0x83   :  { %v1742_v40 = vpack.c.bf16 %v320_v39, %v317_v38  ;;  %v976_v48 = vld [vmem:[%s3125_s3 + $0x98] sm:$0xff]  ;;  %v977_v53 = vld [vmem:[%s3125_s3 + $0xa0] sm:$0xff]  ;;  %v978_v54 = vld [vmem:[%s3125_s3 + $0xa8] sm:$0xff] }
  0x84   :  { %526 = vmatmul.mubr.f32.vlgmr.msra.gmra.mrb[0].mxu0 %v2304_v28  ;;  %v249_v28 = vld [vmem:[%s3123_s1 + $0x6b0] sm:$0xff]  ;;  %v960_v52 = vld [vmem:[%s3125_s3 + $0x18] sm:$0xff]  ;;  %v962_v61 = vld [vmem:[%s3125_s3 + $0x28] sm:$0xff] }
  0x85   :  { %1683 = vmatpush1.bf16.msra.mxu0 %v1682_v13  ;;  %596 = vmatprep.mubr.f32.mxu0 %v2532_v20  ;;  %v1690_v20 = vpack.c.bf16 %v242_v23, %v239_v22  ;;  %v1692_v25 = vpack.c.bf16 %v249_v28, %v246_v24  ;;  %v1722_v13 = vpack.c.bf16 %v290_v59, %v287_v10  ;;  %v299_v22 = vld [vmem:[%s3123_s1 + $0x840] sm:$0xff]  ;;  %v302_v23 = vld [vmem:[%s3123_s1 + $0x858] sm:$0xff]  ;;  %v309_v28 = vld [vmem:[%s3123_s1 + $0x890] sm:$0xff] }
  0x86   :  { %1685 = vmatprep.subr.bf16.mxu0 %v1684_v14  ;;  %v1724_v14 = vpack.c.bf16 %v297_v12, %v294_v11  ;;  %v306_v24 = vld [vmem:[%s3123_s1 + $0x878] sm:$0xff]  ;;  %v979_v62 = vld [vmem:[%s3125_s3 + $0xb0] sm:$0xff]  ;;  %v981_v4 = vld [vmem:[%s3125_s3 + $0xc0] sm:$0xff]  ;;  %s1946_s1 = smov [#allocation2]  }
  0x87   :  { %v980_v63 = vld [vmem:[%s3125_s3 + $0xb8] sm:$0xff]  ;;  %v982_v5 = vld [vmem:[%s3125_s3 + $0xc8] sm:$0xff]  ;;  %v983_v59 = vld [vmem:[%s3125_s3 + $0xd0] sm:$0xff]  ;;  %s1326_s18 = sshll.u32 %s1946_s1, 4  ;;  %s1327_s18 = int_to_ptr.vmem [resolvable:$true] %s1326_s18 }
  0x88   :  { %v964_v3 = vld [vmem:[%s3125_s3 + $0x38] sm:$0xff]  ;;  %v966_v10 = vld [vmem:[%s3125_s3 + $0x48] sm:$0xff]  ;;  %p1923_p1 = scmp.lt.s32.totalorder %s1327_s18, %s1327_s18 }
  0x89   :  { %1687 = vmatpush1.bf16.msra.mxu0 %v1686_v19  ;;  %v1726_v19 = vpack.c.bf16 %v296_v16, %v293_v15  ;;  %v984_v11 = vld [vmem:[%s3125_s3 + $0xd8] sm:$0xff] }
  0x8a   :  { %1689 = vmatprep.subr.bf16.mxu0 %v1688_v21  ;;  %v1728_v21 = vpack.c.bf16 %v303_v18, %v300_v17  ;;  %v968_v15 = vld [vmem:[%s3125_s3 + $0x58] sm:$0xff] }
  0x8d   :  { %1691 = vmatpush1.bf16.msra.mxu0 %v1690_v20  ;;  %v1730_v20 = vpack.c.bf16 %v302_v23, %v299_v22  ;;  %v985_v23 = vld [vmem:[%s3125_s3 + $0xe0] sm:$0xff] }
  0x8e   :  { %1693 = vmatprep.subr.bf16.mxu0 %v1692_v25  ;;  %v1732_v25 = vpack.c.bf16 %v309_v28, %v306_v24  ;;  %v986_v24 = vld [vmem:[%s3125_s3 + $0xe8] sm:$0xff] }
  0x8f   :  { %v1871_v28 = vpack.c.bf16 %v986_v24, %v985_v23 }
  0x91   :  { %1695 = vmatpush1.bf16.msra.mxu0 %v1694_v32  ;;  %v1734_v32 = vpack.c.bf16 %v308_v27, %v305_v26  ;;  %v987_v27 = vld [vmem:[%s3125_s3 + $0xf0] sm:$0xff] }
  0x92   :  { %1697 = vmatprep.subr.bf16.mxu0 %v1696_v33  ;;  %v1736_v33 = vpack.c.bf16 %v315_v31, %v312_v30  ;;  %v988_v30 = vld [vmem:[%s3125_s3 + $0xf8] sm:$0xff] }
  0x93   :  { %v1875_v31 = vpack.c.bf16 %v988_v30, %v987_v27  ;;  %v1236_v27 = vld [vmem:[%s3129_s7 + $0x18] sm:$0xff] }
  0x95   :  { %1699 = vmatpush1.bf16.msra.mxu0 %v1698_v43  ;;  %v1738_v43 = vpack.c.bf16 %v314_v44, %v311_v34  ;;  %v341_v44 = vsub.s32 2, %v2052_v29 }
  0x96   :  { %1701 = vmatprep.subr.bf16.mxu0 %v1700_v37  ;;  %v1740_v37 = vpack.c.bf16 %v321_v36, %v318_v35  ;;  %v329_v35 = vld [vmem:[%s3124_s2] sm:$0x7] }
  0x97   :  { %v342_v36 = vrot.slane %v329_v35, %v341_v44 }
  0x99   :  { %1703 = vmatpush1.bf16.msra.mxu0 %v1702_v41  ;;  %v974_v41 = vld [vmem:[%s3125_s3 + $0x88] sm:$0xff] }
  0x9a   :  { %1705 = vmatprep.subr.bf16.mxu0 %v1704_v45  ;;  %v957_v45 = vld [vmem:[%s3125_s3] sm:$0xff]  ;;  %v1847_v46 = vpack.c.bf16 %v974_v41, %v973_v42 }
  0x9b   :  { %v1849_v49 = vpack.c.bf16 %v958_v47, %v957_v45 }
  0x9c   :  { %1848 = vmatprep.subr.bf16.mxu1 %v1847_v46 }
  0x9d   :  { %1707 = vmatpush1.bf16.msra.mxu0 %v1706_v50  ;;  %1850 = vmatpush3.bf16.msra.mxu1 %v1849_v49  ;;  %v333_v49 = vsub.s32 0, %v2052_v29 }
  0x9e   :  { %1709 = vmatprep.subr.bf16.mxu0 %v1708_v51  ;;  %v959_v51 = vld [vmem:[%s3125_s3 + $0x10] sm:$0xff] }
  0x9f   :  { %v1853_v56 = vpack.c.bf16 %v960_v52, %v959_v51  ;;  %v334_v51 = vrot.slane %v329_v35, %v333_v49 }
  0xa1   :  { %1711 = vmatpush1.bf16.msra.mxu0 %v1710_v58  ;;  %v1855_v58 = vpack.c.bf16 %v978_v54, %v977_v53 }
  0xa2   :  { %1713 = vmatprep.subr.bf16.mxu0 %v1712_v60  ;;  %v961_v60 = vld [vmem:[%s3125_s3 + $0x20] sm:$0xff] }
  0xa3   :  { %v1857_v0 = vpack.c.bf16 %v962_v61, %v961_v60  ;;  %v989_v61 = vld [vmem:[%s3125_s3 + $0x100] sm:$0xff] }
  0xa5   :  { %1715 = vmatpush1.bf16.msra.mxu0 %v1714_v1  ;;  %v1859_v1 = vpack.c.bf16 %v980_v63, %v979_v62  ;;  %v990_v62 = vld [vmem:[%s3125_s3 + $0x108] sm:$0xff] }
  0xa6   :  { %1717 = vmatprep.subr.bf16.mxu0 %v1716_v2  ;;  %v963_v2 = vld [vmem:[%s3125_s3 + $0x30] sm:$0xff] }
  0xa7   :  { %v1861_v6 = vpack.c.bf16 %v964_v3, %v963_v2  ;;  %v992_v3 = vld [vmem:[%s3125_s3 + $0x118] sm:$0xff] }
  0xa9   :  { %1719 = vmatpush1.bf16.msra.mxu0 %v1718_v8  ;;  %v1863_v8 = vpack.c.bf16 %v982_v5, %v981_v4 }
  0xaa   :  { %1721 = vmatprep.subr.bf16.mxu0 %v1720_v9  ;;  %v965_v9 = vld [vmem:[%s3125_s3 + $0x40] sm:$0xff] }
  0xab   :  { %v1865_v12 = vpack.c.bf16 %v966_v10, %v965_v9  ;;  %v1147_v10 = vld [vmem:[%s3127_s5 + $0x10] sm:$0xff] }
  0xad   :  { %1723 = vmatpush1.bf16.msra.mxu0 %v1722_v13  ;;  %v1867_v13 = vpack.c.bf16 %v984_v11, %v983_v59  ;;  %v1148_v59 = vld [vmem:[%s3127_s5 + $0x18] sm:$0xff] }
  0xae   :  { %1725 = vmatprep.subr.bf16.mxu0 %v1724_v14  ;;  %v967_v14 = vld [vmem:[%s3125_s3 + $0x50] sm:$0xff]  ;;  %v1889_v11 = vpack.c.bf16 %v1148_v59, %v1147_v10 }
  0xaf   :  { %v1869_v16 = vpack.c.bf16 %v968_v15, %v967_v14 }
  0xb1   :  { %1727 = vmatpush1.bf16.msra.mxu0 %v1726_v19 }
  0xb2   :  { %1729 = vmatprep.subr.bf16.mxu0 %v1728_v21 }
  0xb5   :  { %1731 = vmatpush1.bf16.msra.mxu0 %v1730_v20  ;;  %v969_v20 = vld [vmem:[%s3125_s3 + $0x60] sm:$0xff] }
  0xb6   :  { %1733 = vmatprep.subr.bf16.mxu0 %v1732_v25  ;;  %v970_v25 = vld [vmem:[%s3125_s3 + $0x68] sm:$0xff] }
  0xb7   :  { %v1873_v26 = vpack.c.bf16 %v970_v25, %v969_v20 }
  0xb9   :  { %1735 = vmatpush1.bf16.msra.mxu0 %v1734_v32  ;;  %v971_v32 = vld [vmem:[%s3125_s3 + $0x70] sm:$0xff] }
  0xba   :  { %1737 = vmatprep.subr.bf16.mxu0 %v1736_v33  ;;  %v972_v33 = vld [vmem:[%s3125_s3 + $0x78] sm:$0xff] }
  0xbb   :  { %v1877_v34 = vpack.c.bf16 %v972_v33, %v971_v32  ;;  %v1238_v32 = vld [vmem:[%s3129_s7 + $0x28] sm:$0xff] }
  0xbd   :  { %1739 = vmatpush1.bf16.msra.mxu0 %v1738_v43 }
  0xbe   :  { %1741 = vmatprep.subr.bf16.mxu0 %v1740_v37 }
  0xc1   :  { %1743 = vmatpush1.bf16.msra.mxu0 %v1742_v40 }
  0xc4   :  { %597 = vmatmul.mubr.f32.vlgmr.msra.gmra.mrb[0].mxu0 %v2103_v55  ;;  %v975_v55 = vld [vmem:[%s3125_s3 + $0x90] sm:$0xff] }
  0xc5   :  { %v1851_v50 = vpack.c.bf16 %v976_v48, %v975_v55 }
  0xc7   :  { %1852 = vmatprep.subr.bf16.mxu1 %v1851_v50  ;;  %v337_v50 = vsub.s32 1, %v2052_v29  ;;  %v991_v29 = vld [vmem:[%s3125_s3 + $0x110] sm:$0xff] }
  0xc8   :  { %1854 = vmatpush3.bf16.msra.mxu1 %v1853_v56  ;;  %v1883_v4 = vpack.c.bf16 %v992_v3, %v991_v29 }
  0xc9   :  { %1856 = vmatprep.subr.bf16.mxu1 %v1855_v58  ;;  %v338_v52 = vrot.slane %v329_v35, %v337_v50 }
  0xcc   :  { %1858 = vmatpush3.bf16.msra.mxu1 %v1857_v0 }
  0xcd   :  { %1860 = vmatprep.subr.bf16.mxu1 %v1859_v1  ;;  %v1880_v1 = vpack.c.bf16 %v990_v62, %v989_v61 }
  0xd0   :  { %1862 = vmatpush3.bf16.msra.mxu1 %v1861_v6  ;;  %v1145_v6 = vld [vmem:[%s3127_s5] sm:$0xff] }
  0xd1   :  { %1864 = vmatprep.subr.bf16.mxu1 %v1863_v8  ;;  %v1146_v8 = vld [vmem:[%s3127_s5 + $0x8] sm:$0xff] }
  0xd2   :  { %v1886_v9 = vpack.c.bf16 %v1146_v8, %v1145_v6 }
  0xd4   :  { %1866 = vmatpush3.bf16.msra.mxu1 %v1865_v12  ;;  %v1149_v12 = vld [vmem:[%s3127_s5 + $0x20] sm:$0xff] }
  0xd5   :  { %1868 = vmatprep.subr.bf16.mxu1 %v1867_v13  ;;  %v1150_v13 = vld [vmem:[%s3127_s5 + $0x28] sm:$0xff] }
  0xd6   :  { %v1892_v14 = vpack.c.bf16 %v1150_v13, %v1149_v12 }
  0xd8   :  { %1870 = vmatpush3.bf16.msra.mxu1 %v1869_v16 }
  0xd9   :  { %1872 = vmatprep.subr.bf16.mxu1 %v1871_v28 }
  0xdc   :  { %1874 = vmatpush3.bf16.msra.mxu1 %v1873_v26  ;;  %v1235_v26 = vld [vmem:[%s3129_s7 + $0x10] sm:$0xff] }
  0xdd   :  { %1876 = vmatprep.subr.bf16.mxu1 %v1875_v31  ;;  %v1898_v30 = vpack.c.bf16 %v1236_v27, %v1235_v26  ;;  %v1237_v31 = vld [vmem:[%s3129_s7 + $0x20] sm:$0xff] }
  0xde   :  { %v1901_v33 = vpack.c.bf16 %v1238_v32, %v1237_v31 }
  0xe0   :  { %1878 = vmatpush3.bf16.msra.mxu1 %v1877_v34  ;;  %v1338_v34 = vld [vmem:[%s3128_s6] ss:$0 sm:$0xff] }
  0xe1   :  { %1879 = vmatprep.subr.bf16.mxu1 %v1944_v57 }
  0xe3   :  { %v669_v17 = vpop.f32.mrb[0].mxu1 }
  0xe4   :  { %v671_v18 = vpop.f32.mrb[1].mxu1 }
 0x103   :  { %v1374_v19 = vpop.f32.mrb[2].mxu1 }
 0x104   :  { %v1375_v21 = vpop.f32.mrb[3].mxu1 }
 0x105   :  { %v1376_v22 = vadd.f32 %v1375_v21, %v1374_v19  ;;  %v1233_v21 = vld [vmem:[%s3129_s7] sm:$0xff] }
 0x107   :  { %v741_v43 = vadd.f32 %v1376_v22, %v342_v36  ;;  %v1234_v22 = vld [vmem:[%s3129_s7 + $0x8] sm:$0xff]  ;;  %s1918_s7 = scalar_lea.vmem %s1327_s18, 32 }
 0x108   :  { %v1895_v20 = vpack.c.bf16 %v1234_v22, %v1233_v21  ;;  %p1919_p0 = scmp.ne.s32.totalorder %s1327_s18, %s1918_s7  ;;  %p1924_p2 = scmp.lt.s32.totalorder %s1918_s7, %s1918_s7 }
 0x10a   :  { %p1925_p3 = por %p1924_p2, %p1923_p1 }
 0x10c   :  { %p1926_p4 = pnand %p1925_p3, %p1919_p0 }
 0x125   :  { %v1409_v37 = vpop.f32.mrb[4].mxu1 }
 0x126   :  { %v1410_v38 = vpop.f32.mrb[5].mxu1 }
 0x127   :  { %v1411_v39 = vadd.f32 %v1410_v38, %v1409_v37 }
 0x129   :  { %v811_v40 = vadd.f32 %v1411_v39, %v741_v43 }
 0x146   :  { %v1444_v42 = vpop.f32.mrb[6].mxu1 }
 0x147   :  { %v1445_v41 = vpop.f32.mrb[7].mxu1 }
 0x148   :  { %v1446_v45 = vadd.f32 %v1445_v41, %v1444_v42 }
 0x14a   :  { %v881_v46 = vadd.f32 %v1446_v45, %v811_v40  ;;  %v950_v47 = vpop.f32.mrb[8].mxu1 }
 0x14b   :  { %v1510_v55 = vpop.f32.mrb[9].mxu1 }
 0x14c   :  { %v951_v48 = vadd.f32 %v950_v47, %v881_v46 }
 0x14e   :  { %v956_v5 = vmax.f32 %v951_v48, 0.0 }
 0x197   :  { %v598_v53 = vpop.f32.mrb[0].mxu0 }
 0x198   :  { %v1903_v54 = vadd.f32 %v598_v53, %v334_v51  ;;  %v600_v56 = vpop.f32.mrb[1].mxu0 }
 0x199   :  { %v1905_v58 = vadd.f32 %v600_v56, %v338_v52 }
 0x19a   :  { %v1904_v60 = vadd.f32 %v1903_v54, %v669_v17 }
 0x19b   :  { %v1906_v63 = vadd.f32 %v1905_v58, %v671_v18  ;;  %v1336_v18 = vld [vmem:[%s3126_s4] ss:$0 sm:$0xff] }
 0x19c   :  { %v954_v2 = vmax.f32 %v1904_v60, 0.0 }
 0x19d   :  { %v955_v0 = vmax.f32 %v1906_v63, 0.0 }
 0x19f   :  { %1068 = vmatprep.mubr.f32.mxu1 %v955_v0 }
 0x1a0   :  { %1069 = vmatmul.mubr.f32.vlgmr.msra.gmra.mrb[10].mxu1 %v954_v2 }
 0x1a1   :  { %1881 = vmatpush3.bf16.msra.mxu1 %v1880_v1  ;;  %1519 = vmatprep.mubr.msk.f32.mxu1 %vm1945_vm1, %v1942_v7 }
 0x1a2   :  { %1882 = vmatprep.subr.bf16.mxu1 %v1944_v57 }
 0x1a5   :  { %1884 = vmatpush3.bf16.msra.mxu1 %v1883_v4 }
 0x1a6   :  { %1885 = vmatprep.subr.bf16.mxu1 %v1944_v57 }
 0x1a8   :  { %1520 = vmatmul.mubr.msk.f32.vlgmr.msra.gmra.mrb[12].mxu1 %vm1000_vm2, %v956_v5 }
 0x1a9   :  { %1534 = vmatprep.mubr.msk.f32.mxu1 %vm1945_vm1, %v1942_v7  ;;  %1887 = vmatpush3.bf16.msra.mxu1 %v1886_v9 }
 0x1aa   :  { %1888 = vmatprep.subr.bf16.mxu1 %v1944_v57 }
 0x1ad   :  { %1890 = vmatpush3.bf16.msra.mxu1 %v1889_v11 }
 0x1ae   :  { %1891 = vmatprep.subr.bf16.mxu1 %v1944_v57 }
 0x1b1   :  { %1893 = vmatpush3.bf16.msra.mxu1 %v1892_v14 }
 0x1b2   :  { %1894 = vmatprep.subr.bf16.mxu1 %v1944_v57 }
 0x273   :  { %v1482_v15 = vpop.f32.mrb[10].mxu1 }
 0x274   :  { %v1483_v16 = vpop.f32.mrb[11].mxu1 }
 0x275   :  { %v1484_v17 = vadd.f32 %v1483_v16, %v1482_v15 }
 0x277   :  { %v1071_v19 = vadd.f32 %v1484_v17, %v1336_v18 }
 0x27b   :  { %v1140_v23 = vpop.f32.mrb[12].mxu1 }
 0x27c   :  { %v1141_v24 = vadd.f32 %v1140_v23, %v1071_v19  ;;  %v1521_v28 = vpop.f32.mrb[13].mxu1 }
 0x27e   :  { %v1144_v25 = vmax.f32 %v1141_v24, 0.0 }
 0x280   :  { %1535 = vmatmul.mubr.msk.f32.vlgmr.msra.gmra.mrb[14].mxu1 %vm1158_vm3, %v1144_v25 }
 0x281   :  { %1896 = vmatpush3.bf16.msra.mxu1 %v1895_v20  ;;  %1549 = vmatprep.mubr.msk.f32.mxu1 %vm1945_vm1, %v1942_v7 }
 0x282   :  { %1897 = vmatprep.subr.bf16.mxu1 %v1944_v57 }
 0x285   :  { %1899 = vmatpush3.bf16.msra.mxu1 %v1898_v30 }
 0x286   :  { %1900 = vmatprep.subr.bf16.mxu1 %v1944_v57  ;;  %v1340_v57 = vld [vmem:[%s3130_s8] ss:$0 sm:$0xff] }
 0x289   :  { %1902 = vmatpush3.bf16.msra.mxu1 %v1901_v33 }
 0x353   :  { %v1228_v7 = vpop.f32.mrb[14].mxu1 }
 0x354   :  { %v1229_v44 = vadd.f32 %v1338_v34, %v1228_v7  ;;  %v1536_v35 = vpop.f32.mrb[15].mxu1 }
 0x356   :  { %v1232_v36 = vmax.f32 %v1229_v44, 0.0 }
 0x358   :  { %1550 = vmatmul.mubr.msk.f32.vlgmr.msra.gmra.mrb[16].mxu1 %vm1158_vm3, %v1232_v36 }
 0x42b   :  { %v1315_v43 = vpop.f32.mrb[16].mxu1 }
 0x42c   :  { %v1316_v37 = vadd.f32 %v1340_v57, %v1315_v43  ;;  %v1551_v38 = vpop.f32.mrb[17].mxu1 }
 0x42e   :  { %1319 = vst [vmem:[#allocation2] sm:$0x3] %v1316_v37 }
 0x42f   :  { %1929 = shalt.err (!%p1926_p4)
}
 0x430   :  { %s1930_s20 = scalar_lea.hbm %s3131_s9, 32 }
 0x431   :  { %p1931_p5 = scmp.ne.s32.totalorder %s3131_s9, %s1930_s20  ;;  %p1934_p6 = scmp.lt.u32.totalorder %s1930_s20, %s3131_s9 }
 0x433   :  { %p1936_p7 = pnand %p1934_p6, %p1931_p5 }
 0x435   :  { %1939 = shalt.err (!%p1936_p7)
}
 0x436   :  { %1329 = dma.vmem_to_hbm [thread:$0]  %s1327_s18, 32, %s3131_s9, [#allocation3]  }
 0x437   :  { %1940 = dma.done.wait [#allocation3], 32  }
 0x438   :  { %1941 = vsyncadd [#allocation3], 4294967264 }
 0x439   :  { %1333 = vsyncpa [#allocation3], 1 }

</bundles_post_ra>
